<compile_context>
chip_gen: v7x
topology: tpu7x:2x2x1
jax: 0.10.0
libtpu: 0.0.40
codegen_flags: <defaults>
</compile_context>

<pallas_src>
import jax
import jax.numpy as jnp
from jax.experimental import pallas as pl
from jax.experimental.pallas import tpu as pltpu

# ---- config (small, synthetic, consistent with the module's __init__) ----
OUTPUT_HEIGHT = 16
OUTPUT_WIDTH = 16
OUTPUT_CHANNEL = 1
D_DIM = 32

IN_DIM = OUTPUT_HEIGHT * OUTPUT_WIDTH * OUTPUT_CHANNEL  # 256
H1 = D_DIM * 2                                          # 64
H2 = D_DIM                                              # 32
OUT = 1

MAX_TILE_B = 4096  # rows per grid step (4 MB f32 x tile; ~18 MB total VMEM)
VMEM_LIMIT_BYTES = 48 * 1024 * 1024


def _round_up(x, m):
    return (x + m - 1) // m * m


def _leaky_relu(x, slope=0.2):
    # max(x, slope*x) == LeakyReLU(slope) for slope in (0, 1): one mul + one max.
    return jnp.maximum(x, slope * x)


def discriminator_kernel(x_ref, w1_ref, b1_ref, w2_ref, b2_ref, w3_ref, b3_ref,
                         o_ref):
    """One batch tile of the fused MLP.

    x_ref : (TILE_B, IN_DIM) caller dtype (f32/bf16) -- streamed per grid step
    w1_ref: (IN_DIM, H1)     bf16   -- VMEM-resident (constant index_map)
    b1_ref: (1, H1)          f32
    w2_ref: (H1, H2)         bf16
    b2_ref: (1, H2)          f32
    w3_ref: (1, H2)          f32    -- final projection as a row vector
    b3_ref: (1, 1)           f32    -- SMEM scalar
    o_ref : (TILE_B, 1)      f32
    """
    # Cast the streamed activations to bf16 in-kernel (no wrapper-side cast
    # pass -> x only crosses HBM once); MXU accumulates in f32.
    x = x_ref[...].astype(jnp.bfloat16)

    # Layer 1: MXU matmul, f32 accumulate; bias add + leaky_relu on the VPU.
    h1 = jnp.dot(x, w1_ref[...], preferred_element_type=jnp.float32)
    h1 = _leaky_relu(h1 + b1_ref[...])

    # Layer 2.
    h2 = jnp.dot(h1.astype(w2_ref.dtype), w2_ref[...],
                 preferred_element_type=jnp.float32)
    h2 = _leaky_relu(h2 + b2_ref[...])

    # Layer 3 (H2 -> 1): VPU multiply + lane reduce (XLU) instead of a
    # 1-lane-wide MXU matmul; bias is an SMEM scalar.
    logits = jnp.sum(h2 * w3_ref[...], axis=-1, keepdims=True) + b3_ref[0, 0]

    # Sigmoid: exp and reciprocal both land on the EUP slot.
    o_ref[...] = pl.reciprocal(1.0 + jnp.exp(-logits),
                               approx=True).astype(o_ref.dtype)


def discriminator_forward(x, params, *, max_tile_b=MAX_TILE_B):
    """x: (B, IN_DIM) float32 (or bfloat16).  Returns (B, 1) float32 in [0, 1]."""
    w1, b1, w2, b2, w3, b3 = params
    B = x.shape[0]
    assert x.shape[1] == IN_DIM, x.shape

    # Batch tile: multiple of 128 (covers f32/bf16 sublane packing), capped so
    # double-buffered x + f32 intermediates fit comfortably in VMEM, and sized
    # so large batches get >=2 grid steps (lets v7x shard the batch axis over
    # both TensorCores via dimension_semantics=("parallel",)).
    tile_b = min(max_tile_b, _round_up(pl.cdiv(max(B, 1), 2), 128))
    grid = (pl.cdiv(B, tile_b),)

    # bf16 MXU operands for the (tiny, VMEM-resident) weights; x streams as-is.
    w1b = w1.astype(jnp.bfloat16)
    w2b = w2.astype(jnp.bfloat16)

    weight_bytes = sum(int(a.size) * a.dtype.itemsize
                       for a in (w1b, b1, w2b, b2, w3, b3))
    cost = pl.CostEstimate(
        flops=2 * B * (IN_DIM * H1 + H1 * H2 + H2),
        transcendentals=2 * B,  # exp + reciprocal per row
        bytes_accessed=B * IN_DIM * x.dtype.itemsize + B * OUT * 4 + weight_bytes,
    )

    out = pl.pallas_call(
        discriminator_kernel,
        out_shape=jax.ShapeDtypeStruct((B, OUT), jnp.float32),
        grid=grid,
        in_specs=[
            # Streamed activation tile (double-buffered HBM->VMEM fetch).
            pl.BlockSpec((tile_b, IN_DIM), lambda i: (i, 0)),
            # Weights / biases: constant index_map -> fetched once, VMEM-resident.
            pl.BlockSpec((IN_DIM, H1), lambda i: (0, 0)),
            pl.BlockSpec((1, H1), lambda i: (0, 0)),
            pl.BlockSpec((H1, H2), lambda i: (0, 0)),
            pl.BlockSpec((1, H2), lambda i: (0, 0)),
            pl.BlockSpec((1, H2), lambda i: (0, 0)),
            # Final bias as an SMEM scalar.
            pl.BlockSpec(memory_space=pltpu.MemorySpace.SMEM),
        ],
        out_specs=pl.BlockSpec((tile_b, OUT), lambda i: (i, 0)),
        compiler_params=pltpu.CompilerParams(
            dimension_semantics=("parallel",),
            vmem_limit_bytes=VMEM_LIMIT_BYTES,
        ),
        cost_estimate=cost,
    )(x, w1b, b1, w2b, b2, w3, b3)

    return out


def init_params(key):
    """Deterministic synthetic params (PyTorch Linear-style uniform init)."""
    ks = jax.random.split(key, 6)

    def uinit(k, shape, fan_in):
        bound = 1.0 / jnp.sqrt(fan_in)
        return jax.random.uniform(k, shape, jnp.float32, -bound, bound)

    # weights stored as (in, out) == W.T of the PyTorch (out, in) weight;
    # the final projection is kept as a (1, H2) row for the in-kernel reduce.
    w1 = uinit(ks[0], (IN_DIM, H1), IN_DIM)
    b1 = uinit(ks[1], (1, H1), IN_DIM)
    w2 = uinit(ks[2], (H1, H2), H1)
    b2 = uinit(ks[3], (1, H2), H1)
    w3 = uinit(ks[4], (1, H2), H2)
    b3 = uinit(ks[5], (1, 1), H2)
    return (w1, b1, w2, b2, w3, b3)


def reference_forward(x, params):
    """Pure-JAX reference mirroring the kernel's precision choices
    (bf16 matmul operands, f32 accumulation / elementwise)."""
    w1, b1, w2, b2, w3, b3 = params
    h1 = jnp.dot(x.astype(jnp.bfloat16), w1.astype(jnp.bfloat16),
                 preferred_element_type=jnp.float32) + b1
    h1 = jnp.maximum(h1, 0.2 * h1)
    h2 = jnp.dot(h1.astype(jnp.bfloat16), w2.astype(jnp.bfloat16),
                 preferred_element_type=jnp.float32) + b2
    h2 = jnp.maximum(h2, 0.2 * h2)
    logits = jnp.sum(h2 * w3, axis=-1, keepdims=True) + b3[0, 0]
    return jax.nn.sigmoid(logits)


if __name__ == "__main__":
    key = jax.random.PRNGKey(0)
    k_x, k_x2, k_x3, k_p = jax.random.split(key, 4)

    params = init_params(k_p)

    # Small case from the spec: the discriminator consumes the flattened image.
    B = 2
    x = jax.random.normal(k_x, (B, IN_DIM), dtype=jnp.float32)
    out = jax.block_until_ready(discriminator_forward(x, params))
    ref = reference_forward(x, params)
    assert out.shape == (B, 1), out.shape
    assert jnp.allclose(out, ref, atol=5e-3, rtol=5e-3), (out, ref)

    # Non-divisible batch: tile_b=384, grid=(2,), ragged (padded) last block.
    B2 = 600
    x2 = jax.random.normal(k_x2, (B2, IN_DIM), dtype=jnp.float32)
    out2 = jax.block_until_ready(discriminator_forward(x2, params))
    ref2 = reference_forward(x2, params)
    assert out2.shape == (B2, 1), out2.shape
    assert jnp.allclose(out2, ref2, atol=5e-3, rtol=5e-3)

    # Large batch: tile_b=4096, grid=(2,) full tiles (big-tile / megacore path).
    B3 = 8192
    x3 = jax.random.normal(k_x3, (B3, IN_DIM), dtype=jnp.float32)
    out3 = jax.block_until_ready(discriminator_forward(x3, params))
    ref3 = reference_forward(x3, params)
    assert out3.shape == (B3, 1), out3.shape
    assert jnp.allclose(out3, ref3, atol=5e-3, rtol=5e-3)

    print("KERNEL_OK")
</pallas_src>

<mosaic_0001>
module attributes {stable_mosaic.version = 11 : i64} {
  func.func @discriminator_kernel(%arg0: i32, %arg1: memref<128x256xf32, #tpu.memory_space<vmem>>, %arg2: memref<256x64xbf16, #tpu.memory_space<vmem>>, %arg3: memref<1x64xf32, #tpu.memory_space<vmem>>, %arg4: memref<64x32xbf16, #tpu.memory_space<vmem>>, %arg5: memref<1x32xf32, #tpu.memory_space<vmem>>, %arg6: memref<1x32xf32, #tpu.memory_space<vmem>>, %arg7: memref<1x1xf32, #tpu.memory_space<smem>>, %arg8: memref<128x1xf32, #tpu.memory_space<vmem>>) attributes {dimension_semantics = [#tpu.dimension_semantics<parallel>], iteration_bounds = array<i64: 1>, scalar_prefetch = 0 : i64, scratch_operands = 0 : i64, tpu.core_type = #tpu.core_type<tc>, window_params = [{transform_indices = @transform_0, window_bounds = array<i64: 128, 256>}, {pipeline_mode = #tpu.pipeline_mode<synchronous>, transform_indices = @transform_1, window_bounds = array<i64: 256, 64>}, {pipeline_mode = #tpu.pipeline_mode<synchronous>, transform_indices = @transform_2, window_bounds = array<i64: 1, 64>}, {pipeline_mode = #tpu.pipeline_mode<synchronous>, transform_indices = @transform_3, window_bounds = array<i64: 64, 32>}, {pipeline_mode = #tpu.pipeline_mode<synchronous>, transform_indices = @transform_4, window_bounds = array<i64: 1, 32>}, {pipeline_mode = #tpu.pipeline_mode<synchronous>, transform_indices = @transform_5, window_bounds = array<i64: 1, 32>}, {transform_indices = @transform_6, window_bounds = array<i64: 1, 1>}, {transform_indices = @transform_7, window_bounds = array<i64: 128, 1>}]} {
    %c0 = arith.constant 0 : index
    %c0_0 = arith.constant 0 : index
    %0 = vector.load %arg1[%c0, %c0_0] : memref<128x256xf32, #tpu.memory_space<vmem>>, vector<128x256xf32>
    %1 = arith.truncf %0 : vector<128x256xf32> to vector<128x256xbf16>
    %c0_1 = arith.constant 0 : index
    %c0_2 = arith.constant 0 : index
    %2 = vector.load %arg2[%c0_1, %c0_2] : memref<256x64xbf16, #tpu.memory_space<vmem>>, vector<256x64xbf16>
    %cst = arith.constant dense<0.000000e+00> : vector<128x64xf32>
    %3 = tpu.matmul %1, %2, %cst {dimension_numbers = #tpu.dot_dimension_numbers<[1], [0], [0], [1], [0, 0, 1, 1], [], []>} : vector<128x256xbf16>, vector<256x64xbf16>, vector<128x64xf32> -> vector<128x64xf32>
    %c0_3 = arith.constant 0 : index
    %c0_4 = arith.constant 0 : index
    %4 = vector.load %arg3[%c0_3, %c0_4] : memref<1x64xf32, #tpu.memory_space<vmem>>, vector<1x64xf32>
    %5 = vector.broadcast %4 : vector<1x64xf32> to vector<128x64xf32>
    %6 = arith.addf %3, %5 : vector<128x64xf32>
    %cst_5 = arith.constant 2.000000e-01 : f32
    %7 = vector.broadcast %cst_5 : f32 to vector<128x64xf32>
    %8 = arith.mulf %7, %6 : vector<128x64xf32>
    %9 = arith.maximumf %6, %8 : vector<128x64xf32>
    %10 = arith.truncf %9 : vector<128x64xf32> to vector<128x64xbf16>
    %c0_6 = arith.constant 0 : index
    %c0_7 = arith.constant 0 : index
    %11 = vector.load %arg4[%c0_6, %c0_7] : memref<64x32xbf16, #tpu.memory_space<vmem>>, vector<64x32xbf16>
    %cst_8 = arith.constant dense<0.000000e+00> : vector<128x32xf32>
    %12 = tpu.matmul %10, %11, %cst_8 {dimension_numbers = #tpu.dot_dimension_numbers<[1], [0], [0], [1], [0, 0, 1, 1], [], []>} : vector<128x64xbf16>, vector<64x32xbf16>, vector<128x32xf32> -> vector<128x32xf32>
    %c0_9 = arith.constant 0 : index
    %c0_10 = arith.constant 0 : index
    %13 = vector.load %arg5[%c0_9, %c0_10] : memref<1x32xf32, #tpu.memory_space<vmem>>, vector<1x32xf32>
    %14 = vector.broadcast %13 : vector<1x32xf32> to vector<128x32xf32>
    %15 = arith.addf %12, %14 : vector<128x32xf32>
    %cst_11 = arith.constant 2.000000e-01 : f32
    %16 = vector.broadcast %cst_11 : f32 to vector<128x32xf32>
    %17 = arith.mulf %16, %15 : vector<128x32xf32>
    %18 = arith.maximumf %15, %17 : vector<128x32xf32>
    %c0_12 = arith.constant 0 : index
    %c0_13 = arith.constant 0 : index
    %19 = vector.load %arg6[%c0_12, %c0_13] : memref<1x32xf32, #tpu.memory_space<vmem>>, vector<1x32xf32>
    %20 = vector.broadcast %19 : vector<1x32xf32> to vector<128x32xf32>
    %21 = arith.mulf %18, %20 : vector<128x32xf32>
    %cst_14 = arith.constant dense<0.000000e+00> : vector<128xf32>
    %22 = vector.multi_reduction <add>, %21, %cst_14 [1] : vector<128x32xf32> to vector<128xf32>
    %23 = vector.shape_cast %22 : vector<128xf32> to vector<128x1xf32>
    %c0_15 = arith.constant 0 : index
    %c0_16 = arith.constant 0 : index
    %24 = memref.load %arg7[%c0_15, %c0_16] : memref<1x1xf32, #tpu.memory_space<smem>>
    %25 = vector.broadcast %24 : f32 to vector<128x1xf32>
    %26 = arith.addf %23, %25 : vector<128x1xf32>
    %cst_17 = arith.constant 0.000000e+00 : f32
    %27 = vector.broadcast %cst_17 : f32 to vector<128x1xf32>
    %28 = arith.subf %27, %26 : vector<128x1xf32>
    %29 = math.exp %28 : vector<128x1xf32>
    %cst_18 = arith.constant 1.000000e+00 : f32
    %30 = vector.broadcast %cst_18 : f32 to vector<128x1xf32>
    %31 = arith.addf %30, %29 : vector<128x1xf32>
    %32 = tpu.reciprocal %31 {approx = true} : vector<128x1xf32> -> vector<128x1xf32>
    %c0_19 = arith.constant 0 : index
    %c0_20 = arith.constant 0 : index
    %33 = vector.load %arg8[%c0_19, %c0_20] : memref<128x1xf32, #tpu.memory_space<vmem>>, vector<128x1xf32>
    tpu.vector_store %arg8[%c0_19, %c0_20], %32 {strides = array<i32>} : memref<128x1xf32, #tpu.memory_space<vmem>>, vector<128x1xf32>,
    return
  }
  func.func @transform_0(%arg0: i32) -> (i32, i32) {
    %c0_i32 = arith.constant 0 : i32
    %c0_i32_0 = arith.constant 0 : i32
    return %arg0, %c0_i32 : i32, i32
  }
  func.func @transform_1(%arg0: i32) -> (i32, i32) {
    %c0_i32 = arith.constant 0 : i32
    %c0_i32_0 = arith.constant 0 : i32
    %c0_i32_1 = arith.constant 0 : i32
    return %c0_i32, %c0_i32_0 : i32, i32
  }
  func.func @transform_2(%arg0: i32) -> (i32, i32) {
    %c0_i32 = arith.constant 0 : i32
    %c0_i32_0 = arith.constant 0 : i32
    %c0_i32_1 = arith.constant 0 : i32
    return %c0_i32, %c0_i32_0 : i32, i32
  }
  func.func @transform_3(%arg0: i32) -> (i32, i32) {
    %c0_i32 = arith.constant 0 : i32
    %c0_i32_0 = arith.constant 0 : i32
    %c0_i32_1 = arith.constant 0 : i32
    return %c0_i32, %c0_i32_0 : i32, i32
  }
  func.func @transform_4(%arg0: i32) -> (i32, i32) {
    %c0_i32 = arith.constant 0 : i32
    %c0_i32_0 = arith.constant 0 : i32
    %c0_i32_1 = arith.constant 0 : i32
    return %c0_i32, %c0_i32_0 : i32, i32
  }
  func.func @transform_5(%arg0: i32) -> (i32, i32) {
    %c0_i32 = arith.constant 0 : i32
    %c0_i32_0 = arith.constant 0 : i32
    %c0_i32_1 = arith.constant 0 : i32
    return %c0_i32, %c0_i32_0 : i32, i32
  }
  func.func @transform_6(%arg0: i32) -> (i32, i32) {
    %c0_i32 = arith.constant 0 : i32
    %c0_i32_0 = arith.constant 0 : i32
    %c0_i32_1 = arith.constant 0 : i32
    return %c0_i32, %c0_i32_0 : i32, i32
  }
  func.func @transform_7(%arg0: i32) -> (i32, i32) {
    %c0_i32 = arith.constant 0 : i32
    %c0_i32_0 = arith.constant 0 : i32
    return %arg0, %c0_i32 : i32, i32
  }
}

</mosaic_0001>

<bundles_post_ra>
// kernel: tpu_custom_call.1
= control target key start
LH: loop header
LB: loop body
LE: loop exit
PB: predicated region body
PF: predicated region fallthrough
CT: control target
= control target key end

     0   :  { %vm803_vm0 = vcmask 523264   ;;  %vm980_vm1 = vcmask 261120   ;;  %vm1127_vm2 = vcmask 7168   ;;  %s1786_s0 = inlined_call_operand.vmem [shape: f32[2,256], index: 0, kind: input, shape index: {}]   ;;  %s1787_s1 = inlined_call_operand.vmem [shape: bf16[256,64], index: 1, kind: input, shape index: {}]   ;;  %s1788_s2 = inlined_call_operand.vmem [shape: f32[1,64], index: 2, kind: input, shape index: {}]   ;;  %s1789_s3 = inlined_call_operand.vmem [shape: bf16[64,32], index: 3, kind: input, shape index: {}]   ;;  %s1790_s4 = inlined_call_operand.vmem [shape: f32[1,32], index: 4, kind: input, shape index: {}]   ;;  %s1791_s5 = inlined_call_operand.vmem [shape: f32[1,32], index: 5, kind: input, shape index: {}]   ;;  %s1792_s6 = inlined_call_operand.<no memory space> [shape: f32[1,1], index: 6, kind: input, shape index: {}]   ;;  %s1793_s7 = inlined_call_operand.vmem [shape: f32[2,1], index: 7, kind: output, shape index: {}]  }
   0x1   :  { %v1331_v0 = vld [vmem:[%s1787_s1 + $0x40] sm:$0xff]   ;;  %v1333_v2 = vld [vmem:[%s1787_s1 + $0x48] sm:$0xff]   ;;  %v1335_v4 = vld [vmem:[%s1787_s1 + $0x50] sm:$0xff]  }
   0x2   :  { %v1332_v1 = vld [vmem:[%s1787_s1] sm:$0xff]   ;;  %1214 = vmatprep.subr.bf16.mxu0 %v1331_v0  ;;  %1314 = vmatprep.subr.bf16.mxu1 %v1331_v0  ;;  %v1334_v3 = vld [vmem:[%s1787_s1 + $0x8] sm:$0xff]   ;;  %v1336_v5 = vld [vmem:[%s1787_s1 + $0x10] sm:$0xff]  }
   0x3   :  { %1215 = vmatpush3.bf16.msra.mxu0 %v1332_v1  ;;  %1322 = vmatpush3.bf16.msra.mxu1 %v1332_v1  ;;  %v1337_v6 = vld [vmem:[%s1787_s1 + $0x58] sm:$0xff]   ;;  %v1339_v8 = vld [vmem:[%s1787_s1 + $0x60] sm:$0xff]   ;;  %v1341_v10 = vld [vmem:[%s1787_s1 + $0x68] sm:$0xff]  }
   0x4   :  { %1216 = vmatprep.subr.bf16.mxu0 %v1333_v2  ;;  %1315 = vmatprep.subr.bf16.mxu1 %v1333_v2  ;;  %v1338_v7 = vld [vmem:[%s1787_s1 + $0x18] sm:$0xff]   ;;  %v1340_v9 = vld [vmem:[%s1787_s1 + $0x20] sm:$0xff]   ;;  %v1342_v11 = vld [vmem:[%s1787_s1 + $0x28] sm:$0xff]  }
   0x5   :  { %v1343_v12 = vld [vmem:[%s1787_s1 + $0x70] sm:$0xff]   ;;  %v1447_v13 = vld.sshfl [vmem:[%s1786_s0] sm:$0xff pattern:$0x76325410]  ;;  %v1345_v18 = vld [vmem:[%s1787_s1 + $0x78] sm:$0xff]  }
   0x6   :  { %v1448_v14 = vld.sshfl [vmem:[%s1786_s0 + $0x8] sm:$0xff pattern:$0x76325410]  ;;  %v1449_v15 = vld.sshfl [vmem:[%s1786_s0 + $0x10] sm:$0xff pattern:$0x76325410] }
   0x7   :  { %1217 = vmatpush3.bf16.msra.mxu0 %v1334_v3  ;;  %1323 = vmatpush3.bf16.msra.mxu1 %v1334_v3  ;;  %v1450_v16 = vld.sshfl [vmem:[%s1786_s0 + $0x18] sm:$0xff pattern:$0x76325410]  ;;  %v1344_v17 = vld [vmem:[%s1787_s1 + $0x30] sm:$0xff]   ;;  %v173_v28 = vcombine.high %v1447_v13, %v1448_v14  ;;  %v172_v30 = vcombine.low %v1447_v13, %v1448_v14 }
   0x8   :  { %1218 = vmatprep.subr.bf16.mxu0 %v1335_v4  ;;  %1316 = vmatprep.subr.bf16.mxu1 %v1335_v4  ;;  %v1451_v19 = vld.sshfl [vmem:[%s1786_s0 + $0x20] sm:$0xff pattern:$0x76325410]  ;;  %v1452_v20 = vld.sshfl [vmem:[%s1786_s0 + $0x28] sm:$0xff pattern:$0x76325410]  ;;  %v191_v29 = vcombine.high %v1449_v15, %v1450_v16  ;;  %v190_v31 = vcombine.low %v1449_v15, %v1450_v16 }
   0x9   :  { %v1453_v21 = vld.sshfl [vmem:[%s1786_s0 + $0x30] sm:$0xff pattern:$0x76325410]  ;;  %v1454_v22 = vld.sshfl [vmem:[%s1786_s0 + $0x38] sm:$0xff pattern:$0x76325410]  ;;  %v209_v32 = vcombine.high %v1451_v19, %v1452_v20  ;;  %v208_v37 = vcombine.low %v1451_v19, %v1452_v20 }
   0xa   :  { %v1346_v23 = vld [vmem:[%s1787_s1 + $0x38] sm:$0xff]   ;;  %v1455_v24 = vld.sshfl [vmem:[%s1786_s0 + $0x40] sm:$0xff pattern:$0x76325410]  ;;  %v227_v33 = vcombine.high %v1453_v21, %v1454_v22  ;;  %v477_v34 = vpack.c.bf16 %v191_v29, %v173_v28  ;;  %v476_v35 = vpack.c.bf16 %v190_v31, %v172_v30  ;;  %v226_v38 = vcombine.low %v1453_v21, %v1454_v22 }
   0xb   :  { %1219 = vmatpush3.bf16.msra.mxu0 %v1336_v5  ;;  %1324 = vmatpush3.bf16.msra.mxu1 %v1336_v5  ;;  %v1456_v25 = vld.sshfl [vmem:[%s1786_s0 + $0x48] sm:$0xff pattern:$0x76325410]  ;;  %v1457_v26 = vld.sshfl [vmem:[%s1786_s0 + $0x50] sm:$0xff pattern:$0x76325410] }
   0xc   :  { %1220 = vmatprep.subr.bf16.mxu0 %v1337_v6  ;;  %1317 = vmatprep.subr.bf16.mxu1 %v1337_v6  ;;  %v1458_v27 = vld.sshfl [vmem:[%s1786_s0 + $0x58] sm:$0xff pattern:$0x76325410]  ;;  %v479_v36 = vpack.c.bf16 %v227_v33, %v209_v32  ;;  %v1459_v39 = vld.sshfl [vmem:[%s1786_s0 + $0x60] sm:$0xff pattern:$0x76325410]  ;;  %v245_v40 = vcombine.high %v1455_v24, %v1456_v25  ;;  %v478_v45 = vpack.c.bf16 %v226_v38, %v208_v37 }
   0xd   :  { %659 = vmatprep.mubr.bf16.mxu0 %v477_v34  ;;  %v263_v41 = vcombine.high %v1457_v26, %v1458_v27  ;;  %v1460_v42 = vld.sshfl [vmem:[%s1786_s0 + $0x68] sm:$0xff pattern:$0x76325410]  ;;  %v1461_v43 = vld.sshfl [vmem:[%s1786_s0 + $0x70] sm:$0xff pattern:$0x76325410]  ;;  %v244_v54 = vcombine.low %v1455_v24, %v1456_v25  ;;  %v262_v55 = vcombine.low %v1457_v26, %v1458_v27 }
   0xe   :  { %v1462_v44 = vld.sshfl [vmem:[%s1786_s0 + $0x78] sm:$0xff pattern:$0x76325410]  ;;  %v1463_v46 = vld.sshfl [vmem:[%s1786_s0 + $0xc0] sm:$0xff pattern:$0x76325410]  ;;  %v281_v57 = vcombine.high %v1459_v39, %v1460_v42 }
   0xf   :  { %1221 = vmatpush3.bf16.msra.mxu0 %v1338_v7  ;;  %1325 = vmatpush3.bf16.msra.mxu1 %v1338_v7  ;;  %v481_v47 = vpack.c.bf16 %v263_v41, %v245_v40  ;;  %v1467_v48 = vld.sshfl [vmem:[%s1786_s0 + $0x80] sm:$0xff pattern:$0x76325410]  ;;  %v1468_v49 = vld.sshfl [vmem:[%s1786_s0 + $0x88] sm:$0xff pattern:$0x76325410]  ;;  %v299_v58 = vcombine.high %v1461_v43, %v1462_v44  ;;  %v480_v63 = vpack.c.bf16 %v262_v55, %v244_v54 }
  0x10   :  { %1222 = vmatprep.subr.bf16.mxu0 %v1339_v8  ;;  %1318 = vmatprep.subr.bf16.mxu1 %v1339_v8  ;;  %v1464_v50 = vld.sshfl [vmem:[%s1786_s0 + $0xc8] sm:$0xff pattern:$0x76325410]  ;;  %v1465_v51 = vld.sshfl [vmem:[%s1786_s0 + $0xd0] sm:$0xff pattern:$0x76325410]  ;;  %v280_v7 = vcombine.low %v1459_v39, %v1460_v42  ;;  %v298_v8 = vcombine.low %v1461_v43, %v1462_v44 }
  0x11   :  { %v1466_v52 = vld.sshfl [vmem:[%s1786_s0 + $0xd8] sm:$0xff pattern:$0x76325410]  ;;  %v1469_v53 = vld.sshfl [vmem:[%s1786_s0 + $0x90] sm:$0xff pattern:$0x76325410]  ;;  %v389_v59 = vcombine.high %v1463_v46, %v1464_v50  ;;  %v388_v60 = vcombine.low %v1463_v46, %v1464_v50  ;;  %v483_v3 = vpack.c.bf16 %v299_v58, %v281_v57 }
  0x12   :  { %v1470_v56 = vld.sshfl [vmem:[%s1786_s0 + $0x98] sm:$0xff pattern:$0x76325410]  ;;  %v407_v61 = vcombine.high %v1465_v51, %v1466_v52  ;;  %v406_v62 = vcombine.low %v1465_v51, %v1466_v52  ;;  %v1471_v2 = vld.sshfl [vmem:[%s1786_s0 + $0xe0] sm:$0xff pattern:$0x76325410]  ;;  %v482_v19 = vpack.c.bf16 %v298_v8, %v280_v7 }
  0x13   :  { %1223 = vmatpush3.bf16.msra.mxu0 %v1340_v9  ;;  %1326 = vmatpush3.bf16.msra.mxu1 %v1340_v9  ;;  %v1472_v4 = vld.sshfl [vmem:[%s1786_s0 + $0xe8] sm:$0xff pattern:$0x76325410]  ;;  %v1473_v5 = vld.sshfl [vmem:[%s1786_s0 + $0xf0] sm:$0xff pattern:$0x76325410]  ;;  %v317_v9 = vcombine.high %v1467_v48, %v1468_v49  ;;  %v334_v24 = vcombine.low %v1469_v53, %v1470_v56 }
  0x14   :  { %1224 = vmatprep.subr.bf16.mxu0 %v1341_v10  ;;  %1319 = vmatprep.subr.bf16.mxu1 %v1341_v10  ;;  %v489_v0 = vpack.c.bf16 %v407_v61, %v389_v59  ;;  %v488_v1 = vpack.c.bf16 %v406_v62, %v388_v60  ;;  %v1474_v6 = vld.sshfl [vmem:[%s1786_s0 + $0xf8] sm:$0xff pattern:$0x76325410]  ;;  %v335_v10 = vcombine.high %v1469_v53, %v1470_v56  ;;  %v1477_v13 = vld.sshfl [vmem:[%s1786_s0 + $0xb0] sm:$0xff pattern:$0x76325410] }
  0x15   :  { %v1478_v14 = vld.sshfl [vmem:[%s1786_s0 + $0xb8] sm:$0xff pattern:$0x76325410]  ;;  %v425_v15 = vcombine.high %v1471_v2, %v1472_v4  ;;  %v424_v16 = vcombine.low %v1471_v2, %v1472_v4  ;;  %v1379_v32 = vld [vmem:[%s1789_s3] sm:$0xff]   ;;  %v1380_v33 = vld [vmem:[%s1789_s3 + $0x8] sm:$0xff]  }
  0x16   :  { %707 = vmatprep.mubr.bf16.mxu1 %v489_v0  ;;  %v485_v20 = vpack.c.bf16 %v335_v10, %v317_v9  ;;  %v371_v26 = vcombine.high %v1477_v13, %v1478_v14  ;;  %v370_v30 = vcombine.low %v1477_v13, %v1478_v14  ;;  %v1381_v34 = vld [vmem:[%s1789_s3 + $0x10] sm:$0xff]   ;;  %v1678_v37 = vld [vmem:[%s1788_s2] ss:$0 sm:$0xff] }
  0x17   :  { %1225 = vmatpush3.bf16.msra.mxu0 %v1342_v11  ;;  %1327 = vmatpush3.bf16.msra.mxu1 %v1342_v11  ;;  %v1475_v11 = vld.sshfl [vmem:[%s1786_s0 + $0xa0] sm:$0xff pattern:$0x76325410] }
  0x18   :  { %1226 = vmatprep.subr.bf16.mxu0 %v1343_v12  ;;  %1320 = vmatprep.subr.bf16.mxu1 %v1343_v12  ;;  %v1476_v12 = vld.sshfl [vmem:[%s1786_s0 + $0xa8] sm:$0xff pattern:$0x76325410] }
  0x19   :  { %v353_v25 = vcombine.high %v1475_v11, %v1476_v12  ;;  %v352_v29 = vcombine.low %v1475_v11, %v1476_v12 }
  0x1b   :  { %1227 = vmatpush3.bf16.msra.mxu0 %v1344_v17  ;;  %1328 = vmatpush3.bf16.msra.mxu1 %v1344_v17  ;;  %v443_v17 = vcombine.high %v1473_v5, %v1474_v6  ;;  %v487_v28 = vpack.c.bf16 %v371_v26, %v353_v25  ;;  %v486_v31 = vpack.c.bf16 %v370_v30, %v352_v29 }
  0x1c   :  { %1228 = vmatprep.subr.bf16.mxu0 %v1345_v18  ;;  %1321 = vmatprep.subr.bf16.mxu1 %v1345_v18  ;;  %v442_v18 = vcombine.low %v1473_v5, %v1474_v6 }
  0x1d   :  { %v491_v21 = vpack.c.bf16 %v443_v17, %v425_v15 }
  0x1e   :  { %v490_v22 = vpack.c.bf16 %v442_v18, %v424_v16 }
  0x1f   :  { %1229 = vmatpush3.bf16.msra.mxu0 %v1346_v23  ;;  %1329 = vmatpush3.bf16.msra.mxu1 %v1346_v23  ;;  %v316_v23 = vcombine.low %v1467_v48, %v1468_v49 }
  0x20   :  { %1290 = vmatprep.subr.bf16.mxu1 %v1379_v32 }
  0x21   :  { %v484_v27 = vpack.c.bf16 %v334_v24, %v316_v23 }
  0x22   :  { %660 = vmatmul.mubr.bf16.vlgmr.msra.gmra.mrb[0].mxu0 %v476_v35  ;;  %708 = vmatmul.mubr.bf16.vlgmr.msra.gmra.mrb[0].mxu1 %v488_v1  ;;  %v1382_v35 = vld [vmem:[%s1789_s3 + $0x18] sm:$0xff]  }
  0x23   :  { %667 = vmatprep.mubr.bf16.mxu0 %v479_v36  ;;  %715 = vmatprep.mubr.bf16.mxu1 %v491_v21 }
  0x24   :  { %1291 = vmatpush3.bf16.msra.mxu1 %v1379_v32 }
  0x25   :  { %1292 = vmatprep.subr.bf16.mxu1 %v1380_v33 }
  0x28   :  { %1293 = vmatpush3.bf16.msra.mxu1 %v1380_v33 }
  0x29   :  { %1294 = vmatprep.subr.bf16.mxu1 %v1381_v34 }
  0x2a   :  { %668 = vmatmul.mubr.bf16.gmra.mrb[4].mxu0 %v478_v45  ;;  %716 = vmatmul.mubr.bf16.gmra.mrb[4].mxu1 %v490_v22 }
  0x2b   :  { %675 = vmatprep.mubr.bf16.mxu0 %v481_v47 }
  0x2c   :  { %1295 = vmatpush3.bf16.msra.mxu1 %v1381_v34 }
  0x2d   :  { %1296 = vmatprep.subr.bf16.mxu1 %v1382_v35 }
  0x30   :  { %1297 = vmatpush3.bf16.msra.mxu1 %v1382_v35 }
  0x32   :  { %676 = vmatmul.mubr.bf16.gmra.mrb[8].mxu0 %v480_v63 }
  0x33   :  { %683 = vmatprep.mubr.bf16.mxu0 %v483_v3 }
  0x3a   :  { %684 = vmatmul.mubr.bf16.gmra.mrb[12].mxu0 %v482_v19 }
  0x3b   :  { %691 = vmatprep.mubr.bf16.mxu0 %v485_v20 }
  0x42   :  { %692 = vmatmul.mubr.bf16.gmra.mrb[16].mxu0 %v484_v27 }
  0x43   :  { %699 = vmatprep.mubr.bf16.mxu0 %v487_v28 }
  0x4a   :  { %700 = vmatmul.mubr.bf16.gmra.mrb[20].mxu0 %v486_v31 }
  0xf5   :  { %v1230_v36 = vpop.f32.mrb[0].mxu0  ;;  %v1266_v59 = vpop.f32.mrb[0].mxu1 }
  0xf6   :  { %v1231_v38 = vpop.f32.mrb[1].mxu0  ;;  %v1267_v62 = vpop.f32.mrb[1].mxu1 }
  0xf7   :  { %v1232_v39 = vadd.f32 %v1231_v38, %v1230_v36  ;;  %v1233_v40 = vpop.f32.mrb[2].mxu0  ;;  %v1268_v0 = vadd.f32 %v1267_v62, %v1266_v59  ;;  %v1269_v1 = vpop.f32.mrb[2].mxu1 }
  0xf8   :  { %v1234_v41 = vpop.f32.mrb[3].mxu0  ;;  %v1270_v6 = vpop.f32.mrb[3].mxu1 }
  0xf9   :  { %v662_v42 = vadd.f32 %v1232_v39, %v1678_v37  ;;  %v1235_v43 = vadd.f32 %v1234_v41, %v1233_v40  ;;  %v710_v8 = vadd.f32 %v1268_v0, %v1678_v37  ;;  %v1271_v9 = vadd.f32 %v1270_v6, %v1269_v1 }
  0xfb   :  { %v724_v44 = vmul.f32 0.2, %v662_v42  ;;  %v665_v45 = vadd.f32 %v1235_v43, %v1678_v37  ;;  %v736_v13 = vmul.f32 0.2, %v710_v8  ;;  %v713_v14 = vadd.f32 %v1271_v9, %v1678_v37 }
  0xfd   :  { %v725_v46 = vmul.f32 0.2, %v665_v45  ;;  %v1236_v47 = vpop.f32.mrb[4].mxu0  ;;  %v740_v49 = vmax.f32 %v662_v42, %v724_v44  ;;  %v752_v17 = vmax.f32 %v710_v8, %v736_v13  ;;  %v737_v18 = vmul.f32 0.2, %v713_v14  ;;  %v1272_v19 = vpop.f32.mrb[4].mxu1 }
  0xfe   :  { %v1237_v48 = vpop.f32.mrb[5].mxu0  ;;  %v1273_v22 = vpop.f32.mrb[5].mxu1 }
  0xff   :  { %v741_v50 = vmax.f32 %v665_v45, %v725_v46  ;;  %v1238_v51 = vadd.f32 %v1237_v48, %v1236_v47  ;;  %v1239_v52 = vpop.f32.mrb[6].mxu0  ;;  %v753_v24 = vmax.f32 %v713_v14, %v737_v18  ;;  %v1274_v25 = vadd.f32 %v1273_v22, %v1272_v19  ;;  %v1275_v26 = vpop.f32.mrb[6].mxu1  ;;  %v1707_v14 = vld [vmem:[%s1790_s4] ss:$0 sm:$0xff] }
 0x100   :  { %v1240_v53 = vpop.f32.mrb[7].mxu0  ;;  %v1276_v31 = vpop.f32.mrb[7].mxu1 }
 0x101   :  { %v756_v54 = vpack.c.bf16 %v741_v50, %v740_v49  ;;  %v670_v55 = vadd.f32 %v1238_v51, %v1678_v37  ;;  %v1241_v56 = vadd.f32 %v1240_v53, %v1239_v52  ;;  %v762_v33 = vpack.c.bf16 %v753_v24, %v752_v17  ;;  %v1716_v24 = vld [vmem:[%s1791_s5] ss:$0 sm:$0xff] }
 0x102   :  { %v718_v34 = vadd.f32 %v1274_v25, %v1678_v37  ;;  %v1277_v35 = vadd.f32 %v1276_v31, %v1275_v26 }
 0x103   :  { %v726_v57 = vmul.f32 0.2, %v670_v55  ;;  %v673_v58 = vadd.f32 %v1241_v56, %v1678_v37  ;;  %1298 = vmatprep.mubr.msk.bf16.mxu1 %vm803_vm0, %v756_v54 }
 0x104   :  { %v738_v40 = vmul.f32 0.2, %v718_v34  ;;  %v721_v41 = vadd.f32 %v1277_v35, %v1678_v37 }
 0x105   :  { %v727_v60 = vmul.f32 0.2, %v673_v58  ;;  %v1242_v61 = vpop.f32.mrb[8].mxu0  ;;  %v742_v2 = vmax.f32 %v670_v55, %v726_v57 }
 0x106   :  { %v1243_v63 = vpop.f32.mrb[9].mxu0  ;;  %v754_v44 = vmax.f32 %v718_v34, %v738_v40  ;;  %v739_v45 = vmul.f32 0.2, %v721_v41 }
 0x107   :  { %v743_v3 = vmax.f32 %v673_v58, %v727_v60  ;;  %v1244_v4 = vadd.f32 %v1243_v63, %v1242_v61  ;;  %v1245_v5 = vpop.f32.mrb[10].mxu0 }
 0x108   :  { %v1246_v7 = vpop.f32.mrb[11].mxu0  ;;  %v755_v49 = vmax.f32 %v721_v41, %v739_v45 }
 0x109   :  { %v757_v10 = vpack.c.bf16 %v743_v3, %v742_v2  ;;  %v678_v11 = vadd.f32 %v1244_v4, %v1678_v37  ;;  %v1247_v12 = vadd.f32 %v1246_v7, %v1245_v5 }
 0x10a   :  { %v763_v55 = vpack.c.bf16 %v755_v49, %v754_v44 }
 0x10b   :  { %v728_v15 = vmul.f32 0.2, %v678_v11  ;;  %v681_v16 = vadd.f32 %v1247_v12, %v1678_v37  ;;  %1299 = vmatmul.mubr.msk.bf16.vlgmr.msra.gmra.mrb[8].mxu1 %vm803_vm0, %v757_v10 }
 0x10d   :  { %v729_v20 = vmul.f32 0.2, %v681_v16  ;;  %v1248_v21 = vpop.f32.mrb[12].mxu0  ;;  %v744_v27 = vmax.f32 %v678_v11, %v728_v15 }
 0x10e   :  { %v1249_v23 = vpop.f32.mrb[13].mxu0 }
 0x10f   :  { %v745_v28 = vmax.f32 %v681_v16, %v729_v20  ;;  %v1250_v29 = vadd.f32 %v1249_v23, %v1248_v21  ;;  %v1251_v30 = vpop.f32.mrb[14].mxu0 }
 0x110   :  { %v1252_v32 = vpop.f32.mrb[15].mxu0 }
 0x111   :  { %v758_v36 = vpack.c.bf16 %v745_v28, %v744_v27  ;;  %v686_v38 = vadd.f32 %v1250_v29, %v1678_v37  ;;  %v1253_v39 = vadd.f32 %v1252_v32, %v1251_v30 }
 0x113   :  { %v730_v42 = vmul.f32 0.2, %v686_v38  ;;  %v689_v43 = vadd.f32 %v1253_v39, %v1678_v37  ;;  %1302 = vmatprep.mubr.msk.bf16.mxu1 %vm803_vm0, %v758_v36 }
 0x115   :  { %v731_v46 = vmul.f32 0.2, %v689_v43  ;;  %v1254_v47 = vpop.f32.mrb[16].mxu0  ;;  %v746_v50 = vmax.f32 %v686_v38, %v730_v42 }
 0x116   :  { %v1255_v48 = vpop.f32.mrb[17].mxu0 }
 0x117   :  { %v747_v51 = vmax.f32 %v689_v43, %v731_v46  ;;  %v1256_v52 = vadd.f32 %v1255_v48, %v1254_v47  ;;  %v1257_v53 = vpop.f32.mrb[18].mxu0 }
 0x118   :  { %v1258_v54 = vpop.f32.mrb[19].mxu0 }
 0x119   :  { %v759_v56 = vpack.c.bf16 %v747_v51, %v746_v50  ;;  %v694_v57 = vadd.f32 %v1256_v52, %v1678_v37  ;;  %v1259_v58 = vadd.f32 %v1258_v54, %v1257_v53 }
 0x11b   :  { %v732_v59 = vmul.f32 0.2, %v694_v57  ;;  %v697_v60 = vadd.f32 %v1259_v58, %v1678_v37  ;;  %1303 = vmatmul.mubr.msk.bf16.gmra.mrb[12].mxu1 %vm803_vm0, %v759_v56 }
 0x11d   :  { %v733_v61 = vmul.f32 0.2, %v697_v60  ;;  %v1260_v62 = vpop.f32.mrb[20].mxu0  ;;  %v748_v0 = vmax.f32 %v694_v57, %v732_v59 }
 0x11e   :  { %v1261_v63 = vpop.f32.mrb[21].mxu0 }
 0x11f   :  { %v749_v1 = vmax.f32 %v697_v60, %v733_v61  ;;  %v1262_v2 = vadd.f32 %v1261_v63, %v1260_v62  ;;  %v1263_v3 = vpop.f32.mrb[22].mxu0 }
 0x120   :  { %v1264_v4 = vpop.f32.mrb[23].mxu0 }
 0x121   :  { %v760_v5 = vpack.c.bf16 %v749_v1, %v748_v0  ;;  %v702_v6 = vadd.f32 %v1262_v2, %v1678_v37  ;;  %v1265_v7 = vadd.f32 %v1264_v4, %v1263_v3 }
 0x123   :  { %v734_v8 = vmul.f32 0.2, %v702_v6  ;;  %v705_v9 = vadd.f32 %v1265_v7, %v1678_v37  ;;  %1306 = vmatprep.mubr.msk.bf16.mxu1 %vm803_vm0, %v760_v5 }
 0x125   :  { %v735_v10 = vmul.f32 0.2, %v705_v9  ;;  %v750_v11 = vmax.f32 %v702_v6, %v734_v8 }
 0x127   :  { %v751_v12 = vmax.f32 %v705_v9, %v735_v10 }
 0x129   :  { %v761_v13 = vpack.c.bf16 %v751_v12, %v750_v11 }
 0x12b   :  { %1307 = vmatmul.mubr.msk.bf16.gmra.mrb[16].mxu1 %vm803_vm0, %v761_v13 }
 0x12c   :  { %1310 = vmatprep.mubr.msk.bf16.mxu1 %vm803_vm0, %v762_v33 }
 0x133   :  { %1311 = vmatmul.mubr.msk.bf16.gmra.mrb[20].mxu1 %vm803_vm0, %v763_v55 }
 0x1de   :  { %v1300_v15 = vpop.f32.mrb[8].mxu1 }
 0x1df   :  { %v871_v37 = vadd.f32 %v1300_v15, %v1707_v14  ;;  %v862_v16 = vpop.f32.mrb[9].mxu1 }
 0x1e0   :  { %v863_v17 = vadd.f32 %v1707_v14, %v862_v16  ;;  %v1301_v18 = vpop.f32.mrb[10].mxu1 }
 0x1e1   :  { %v927_v19 = vmul.f32 0.2, %v871_v37  ;;  %v874_v20 = vadd.f32 %v1301_v18, %v1707_v14  ;;  %v865_v21 = vpop.f32.mrb[11].mxu1 }
 0x1e2   :  { %v925_v22 = vmul.f32 0.2, %v863_v17  ;;  %v866_v23 = vadd.f32 %v1707_v14, %v865_v21 }
 0x1e3   :  { %v943_v25 = vmax.f32 %v871_v37, %v927_v19  ;;  %v928_v26 = vmul.f32 0.2, %v874_v20 }
 0x1e4   :  { %v941_v27 = vmax.f32 %v863_v17, %v925_v22  ;;  %v926_v28 = vmul.f32 0.2, %v866_v23 }
 0x1e5   :  { %v944_v29 = vmax.f32 %v874_v20, %v928_v26  ;;  %v966_v30 = vmul.f32 %v1716_v24, %v943_v25 }
 0x1e6   :  { %v942_v31 = vmax.f32 %v866_v23, %v926_v28  ;;  %v964_v32 = vmul.f32 %v1716_v24, %v941_v27 }
 0x1e7   :  { %v987_v33 = vsel %vm980_vm1, %v966_v30, 0.0  ;;  %v967_v34 = vmul.f32 %v1716_v24, %v944_v29 }
 0x1e8   :  { %988 = vadd.xlane.f32.xlu1 %v987_v33  ;;  %v981_v35 = vsel %vm980_vm1, %v964_v32, 0.0  ;;  %v965_v36 = vmul.f32 %v1716_v24, %v942_v31 }
 0x1e9   :  { %982 = vadd.xlane.f32.xlu0 %v981_v35  ;;  %v990_v38 = vsel %vm980_vm1, %v967_v34, 0.0 }
 0x1ea   :  { %v984_v39 = vsel %vm980_vm1, %v965_v36, 0.0 }
 0x1ec   :  { %991 = vadd.xlane.f32.xlu1 %v990_v38 }
 0x1ed   :  { %985 = vadd.xlane.f32.xlu0 %v984_v39 }
 0x1ee   :  { %v1304_v40 = vpop.f32.mrb[12].mxu1 }
 0x1ef   :  { %v887_v41 = vadd.f32 %v1304_v40, %v1707_v14  ;;  %v878_v42 = vpop.f32.mrb[13].mxu1 }
 0x1f0   :  { %v879_v43 = vadd.f32 %v1707_v14, %v878_v42  ;;  %v1305_v44 = vpop.f32.mrb[14].mxu1 }
 0x1f1   :  { %v931_v45 = vmul.f32 0.2, %v887_v41  ;;  %v890_v46 = vadd.f32 %v1305_v44, %v1707_v14  ;;  %v881_v47 = vpop.f32.mrb[15].mxu1 }
 0x1f2   :  { %v929_v48 = vmul.f32 0.2, %v879_v43  ;;  %v882_v49 = vadd.f32 %v1707_v14, %v881_v47 }
 0x1f3   :  { %v947_v50 = vmax.f32 %v887_v41, %v931_v45  ;;  %v932_v51 = vmul.f32 0.2, %v890_v46 }
 0x1f4   :  { %v945_v52 = vmax.f32 %v879_v43, %v929_v48  ;;  %v930_v53 = vmul.f32 0.2, %v882_v49 }
 0x1f5   :  { %v948_v54 = vmax.f32 %v890_v46, %v932_v51  ;;  %v970_v55 = vmul.f32 %v1716_v24, %v947_v50 }
 0x1f6   :  { %v946_v56 = vmax.f32 %v882_v49, %v930_v53  ;;  %v968_v59 = vmul.f32 %v1716_v24, %v945_v52  ;;  %v1765_v49 = vstv %s1792_s6 }
 0x1f7   :  { %v999_v57 = vsel %vm980_vm1, %v970_v55, 0.0  ;;  %v971_v58 = vmul.f32 %v1716_v24, %v948_v54 }
 0x1f8   :  { %1000 = vadd.xlane.f32.xlu0 %v999_v57  ;;  %v969_v61 = vmul.f32 %v1716_v24, %v946_v56  ;;  %v993_v62 = vsel %vm980_vm1, %v968_v59, 0.0 }
 0x1f9   :  { %v1002_v60 = vsel %vm980_vm1, %v971_v58, 0.0 }
 0x1fa   :  { %1003 = vadd.xlane.f32.xlu1 %v1002_v60  ;;  %v996_v63 = vsel %vm980_vm1, %v969_v61, 0.0 }
 0x1fc   :  { %994 = vadd.xlane.f32.xlu0 %v993_v62 }
 0x1fe   :  { %v1308_v0 = vpop.f32.mrb[16].mxu1  ;;  %997 = vadd.xlane.f32.xlu1 %v996_v63 }
 0x1ff   :  { %v903_v1 = vadd.f32 %v1308_v0, %v1707_v14  ;;  %v894_v2 = vpop.f32.mrb[17].mxu1 }
 0x200   :  { %v895_v3 = vadd.f32 %v1707_v14, %v894_v2  ;;  %v1309_v4 = vpop.f32.mrb[18].mxu1 }
 0x201   :  { %v935_v5 = vmul.f32 0.2, %v903_v1  ;;  %v906_v6 = vadd.f32 %v1309_v4, %v1707_v14  ;;  %v897_v7 = vpop.f32.mrb[19].mxu1 }
 0x202   :  { %v933_v8 = vmul.f32 0.2, %v895_v3  ;;  %v898_v9 = vadd.f32 %v1707_v14, %v897_v7 }
 0x203   :  { %v951_v10 = vmax.f32 %v903_v1, %v935_v5  ;;  %v936_v11 = vmul.f32 0.2, %v906_v6 }
 0x204   :  { %v949_v12 = vmax.f32 %v895_v3, %v933_v8  ;;  %v934_v13 = vmul.f32 0.2, %v898_v9 }
 0x205   :  { %v952_v15 = vmax.f32 %v906_v6, %v936_v11  ;;  %v974_v37 = vmul.f32 %v1716_v24, %v951_v10 }
 0x206   :  { %v950_v16 = vmax.f32 %v898_v9, %v934_v13  ;;  %v1312_v17 = vpop.f32.mrb[20].mxu1  ;;  %v972_v22 = vmul.f32 %v1716_v24, %v949_v12 }
 0x207   :  { %v919_v18 = vadd.f32 %v1312_v17, %v1707_v14  ;;  %v910_v19 = vpop.f32.mrb[21].mxu1  ;;  %v1011_v20 = vsel %vm980_vm1, %v974_v37, 0.0  ;;  %v975_v21 = vmul.f32 %v1716_v24, %v952_v15 }
 0x208   :  { %v911_v23 = vadd.f32 %v1707_v14, %v910_v19  ;;  %v1313_v25 = vpop.f32.mrb[22].mxu1  ;;  %1012 = vadd.xlane.f32.xlu0 %v1011_v20  ;;  %v973_v30 = vmul.f32 %v1716_v24, %v950_v16  ;;  %v1005_v34 = vsel %vm980_vm1, %v972_v22, 0.0 }
 0x209   :  { %v939_v26 = vmul.f32 0.2, %v919_v18  ;;  %v922_v27 = vadd.f32 %v1313_v25, %v1707_v14  ;;  %v913_v28 = vpop.f32.mrb[23].mxu1  ;;  %v1014_v29 = vsel %vm980_vm1, %v975_v21, 0.0 }
 0x20a   :  { %v937_v31 = vmul.f32 0.2, %v911_v23  ;;  %v914_v32 = vadd.f32 %v1707_v14, %v913_v28  ;;  %1015 = vadd.xlane.f32.xlu1 %v1014_v29  ;;  %v1008_v39 = vsel %vm980_vm1, %v973_v30, 0.0 }
 0x20b   :  { %v940_v33 = vmul.f32 0.2, %v922_v27  ;;  %v955_v35 = vmax.f32 %v919_v18, %v939_v26 }
 0x20c   :  { %v953_v36 = vmax.f32 %v911_v23, %v937_v31  ;;  %v938_v38 = vmul.f32 0.2, %v914_v32  ;;  %1006 = vadd.xlane.f32.xlu0 %v1005_v34 }
 0x20d   :  { %v956_v40 = vmax.f32 %v922_v27, %v940_v33  ;;  %v978_v14 = vmul.f32 %v1716_v24, %v955_v35 }
 0x20e   :  { %v954_v41 = vmax.f32 %v914_v32, %v938_v38  ;;  %1009 = vadd.xlane.f32.xlu1 %v1008_v39  ;;  %v976_v42 = vmul.f32 %v1716_v24, %v953_v36 }
 0x20f   :  { %v979_v46 = vmul.f32 %v1716_v24, %v956_v40  ;;  %v1023_v47 = vsel %vm980_vm1, %v978_v14, 0.0 }
 0x210   :  { %v1017_v43 = vsel %vm980_vm1, %v976_v42, 0.0  ;;  %v977_v44 = vmul.f32 %v1716_v24, %v954_v41 }
 0x211   :  { %1018 = vadd.xlane.f32.xlu0 %v1017_v43  ;;  %v1026_v48 = vsel %vm980_vm1, %v979_v46, 0.0 }
 0x212   :  { %v1020_v45 = vsel %vm980_vm1, %v977_v44, 0.0 }
 0x213   :  { %1021 = vadd.xlane.f32.xlu1 %v1020_v45 }
 0x215   :  { %1024 = vadd.xlane.f32.xlu0 %v1023_v47 }
 0x217   :  { %1027 = vadd.xlane.f32.xlu1 %v1026_v48 }
 0x275   :  { %v989_v50 = vpop.xlane.xlu1 %988 }
 0x276   :  { %v1033_v51 = vadd.f32 %v1765_v49, %v989_v50  ;;  %v983_v52 = vpop.xlane.xlu0 %982 }
 0x277   :  { %v1031_v53 = vadd.f32 %v1765_v49, %v983_v52 }
 0x278   :  { %v1049_v54 = vsub.f32 0.0, %v1033_v51 }
 0x279   :  { %v1047_v24 = vsub.f32 0.0, %v1031_v53  ;;  %v992_v55 = vpop.xlane.xlu1 %991 }
 0x27a   :  { %v1067_v56 = vmul.f32 1.442695, %v1049_v54  ;;  %v1034_v57 = vadd.f32 %v1765_v49, %v992_v55  ;;  %v986_v58 = vpop.xlane.xlu0 %985 }
 0x27b   :  { %v1063_v59 = vmul.f32 1.442695, %v1047_v24  ;;  %v1032_v60 = vadd.f32 %v1765_v49, %v986_v58 }
 0x27c   :  { %1383 = vpow2.f32 %v1067_v56  ;;  %v1050_v61 = vsub.f32 0.0, %v1034_v57 }
 0x27d   :  { %1385 = vpow2.f32 %v1063_v59  ;;  %v1048_v62 = vsub.f32 0.0, %v1032_v60 }
 0x27e   :  { %v1069_v63 = vmul.f32 1.442695, %v1050_v61 }
 0x27f   :  { %v1065_v0 = vmul.f32 1.442695, %v1048_v62 }
 0x280   :  { %1387 = vpow2.f32 %v1069_v63 }
 0x281   :  { %1389 = vpow2.f32 %v1065_v0 }
 0x285   :  { %v1001_v1 = vpop.xlane.xlu0 %1000 }
 0x286   :  { %v1384_v2 = vpop.eup %1383  ;;  %v1037_v3 = vadd.f32 %v1765_v49, %v1001_v1 }
 0x287   :  { %v1386_v4 = vpop.eup %1385  ;;  %v1097_v5 = vadd.f32 1.0, %v1384_v2  ;;  %v1004_v6 = vpop.xlane.xlu1 %1003 }
 0x288   :  { %v1095_v7 = vadd.f32 1.0, %v1386_v4  ;;  %v1053_v8 = vsub.f32 0.0, %v1037_v3  ;;  %v1038_v9 = vadd.f32 %v1765_v49, %v1004_v6 }
 0x289   :  { %1391 = vrcp.f32 %v1097_v5  ;;  %v995_v10 = vpop.xlane.xlu0 %994 }
 0x28a   :  { %v1388_v11 = vpop.eup %1387  ;;  %1393 = vrcp.f32 %v1095_v7  ;;  %v1075_v12 = vmul.f32 1.442695, %v1053_v8  ;;  %v1054_v13 = vsub.f32 0.0, %v1038_v9  ;;  %v1035_v15 = vadd.f32 %v1765_v49, %v995_v10 }
 0x28b   :  { %v1390_v37 = vpop.eup %1389  ;;  %v1098_v16 = vadd.f32 1.0, %v1388_v11  ;;  %v998_v17 = vpop.xlane.xlu1 %997 }
 0x28c   :  { %v1096_v18 = vadd.f32 1.0, %v1390_v37  ;;  %1395 = vpow2.f32 %v1075_v12  ;;  %v1077_v19 = vmul.f32 1.442695, %v1054_v13  ;;  %v1051_v20 = vsub.f32 0.0, %v1035_v15 }
 0x28d   :  { %1397 = vrcp.f32 %v1098_v16  ;;  %v1036_v21 = vadd.f32 %v1765_v49, %v998_v17 }
 0x28e   :  { %1399 = vrcp.f32 %v1096_v18  ;;  %v1071_v22 = vmul.f32 1.442695, %v1051_v20 }
 0x28f   :  { %1401 = vpow2.f32 %v1077_v19  ;;  %v1052_v23 = vsub.f32 0.0, %v1036_v21 }
 0x290   :  { %1403 = vpow2.f32 %v1071_v22 }
 0x291   :  { %v1073_v25 = vmul.f32 1.442695, %v1052_v23 }
 0x293   :  { %v1392_v26 = vpop.eup %1391  ;;  %1405 = vpow2.f32 %v1073_v25 }
 0x294   :  { %v1394_v27 = vpop.eup %1393 }
 0x295   :  { %1128 = vst.msk [vmem:[#allocation3] sm:$0xff] %vm1127_vm2, %v1394_v27  ;;  %v1013_v28 = vpop.xlane.xlu0 %1012 }
 0x296   :  { %v1396_v29 = vpop.eup %1395  ;;  %v1041_v30 = vadd.f32 %v1765_v49, %v1013_v28 }
 0x297   :  { %v1398_v31 = vpop.eup %1397  ;;  %v1101_v32 = vadd.f32 1.0, %v1396_v29  ;;  %v1016_v33 = vpop.xlane.xlu1 %1015 }
 0x298   :  { %v1400_v34 = vpop.eup %1399  ;;  %v1057_v35 = vsub.f32 0.0, %v1041_v30  ;;  %v1042_v36 = vadd.f32 %v1765_v49, %v1016_v33 }
 0x299   :  { %v1402_v38 = vpop.eup %1401  ;;  %1407 = vrcp.f32 %v1101_v32  ;;  %v1007_v39 = vpop.xlane.xlu0 %1006 }
 0x29a   :  { %v1404_v40 = vpop.eup %1403  ;;  %v1102_v41 = vadd.f32 1.0, %v1402_v38  ;;  %v1083_v42 = vmul.f32 1.442695, %v1057_v35  ;;  %v1058_v43 = vsub.f32 0.0, %v1042_v36  ;;  %v1039_v44 = vadd.f32 %v1765_v49, %v1007_v39 }
 0x29b   :  { %v1099_v14 = vadd.f32 1.0, %v1404_v40  ;;  %v1010_v45 = vpop.xlane.xlu1 %1009 }
 0x29c   :  { %v1161_v46 = vld [vmem:[#allocation3] sm:$0x3]  ;;  %1409 = vrcp.f32 %v1102_v41  ;;  %v1085_v47 = vmul.f32 1.442695, %v1058_v43  ;;  %v1055_v48 = vsub.f32 0.0, %v1039_v44  ;;  %v1040_v50 = vadd.f32 %v1765_v49, %v1010_v45 }
 0x29d   :  { %v1406_v51 = vpop.eup %1405  ;;  %1162 = vst [vmem:[%s1793_s7] sm:$0x3] %v1161_v46  ;;  %1411 = vrcp.f32 %v1099_v14 }
 0x29e   :  { %v1100_v52 = vadd.f32 1.0, %v1406_v51  ;;  %1413 = vpow2.f32 %v1083_v42  ;;  %v1079_v53 = vmul.f32 1.442695, %v1055_v48  ;;  %v1056_v54 = vsub.f32 0.0, %v1040_v50  ;;  %v1019_v24 = vpop.xlane.xlu0 %1018 }
 0x29f   :  { %1415 = vpow2.f32 %v1085_v47  ;;  %v1043_v55 = vadd.f32 %v1765_v49, %v1019_v24 }
 0x2a0   :  { %1417 = vrcp.f32 %v1100_v52  ;;  %v1081_v56 = vmul.f32 1.442695, %v1056_v54  ;;  %v1022_v57 = vpop.xlane.xlu1 %1021 }
 0x2a1   :  { %1419 = vpow2.f32 %v1079_v53  ;;  %v1059_v58 = vsub.f32 0.0, %v1043_v55  ;;  %v1044_v59 = vadd.f32 %v1765_v49, %v1022_v57 }
 0x2a2   :  { %1421 = vpow2.f32 %v1081_v56  ;;  %v1025_v60 = vpop.xlane.xlu0 %1024 }
 0x2a3   :  { %v1408_v61 = vpop.eup %1407  ;;  %v1087_v62 = vmul.f32 1.442695, %v1059_v58  ;;  %v1060_v63 = vsub.f32 0.0, %v1044_v59  ;;  %v1045_v0 = vadd.f32 %v1765_v49, %v1025_v60 }
 0x2a4   :  { %v1028_v1 = vpop.xlane.xlu1 %1027 }
 0x2a5   :  { %1423 = vpow2.f32 %v1087_v62  ;;  %v1089_v2 = vmul.f32 1.442695, %v1060_v63  ;;  %v1061_v3 = vsub.f32 0.0, %v1045_v0  ;;  %v1046_v4 = vadd.f32 %v1765_v49, %v1028_v1 }
 0x2a6   :  { %v1410_v5 = vpop.eup %1409 }
 0x2a7   :  { %v1412_v6 = vpop.eup %1411  ;;  %1425 = vpow2.f32 %v1089_v2  ;;  %v1091_v7 = vmul.f32 1.442695, %v1061_v3  ;;  %v1062_v8 = vsub.f32 0.0, %v1046_v4 }
 0x2a8   :  { %v1414_v9 = vpop.eup %1413 }
 0x2a9   :  { %v1416_v10 = vpop.eup %1415  ;;  %v1105_v11 = vadd.f32 1.0, %v1414_v9  ;;  %1427 = vpow2.f32 %v1091_v7  ;;  %v1093_v12 = vmul.f32 1.442695, %v1062_v8 }
 0x2aa   :  { %v1418_v13 = vpop.eup %1417  ;;  %v1106_v15 = vadd.f32 1.0, %v1416_v10 }
 0x2ab   :  { %v1420_v37 = vpop.eup %1419  ;;  %1429 = vrcp.f32 %v1105_v11 }
 0x2ac   :  { %v1422_v16 = vpop.eup %1421  ;;  %1431 = vrcp.f32 %v1106_v15  ;;  %v1103_v17 = vadd.f32 1.0, %v1420_v37 }
 0x2ad   :  { %v1104_v18 = vadd.f32 1.0, %v1422_v16  ;;  %1433 = vpow2.f32 %v1093_v12 }
 0x2ae   :  { %1435 = vrcp.f32 %v1103_v17 }
 0x2af   :  { %v1424_v49 = vpop.eup %1423  ;;  %1437 = vrcp.f32 %v1104_v18 }
 0x2b0   :  { %v1107_v19 = vadd.f32 1.0, %v1424_v49 }
 0x2b1   :  { %v1426_v20 = vpop.eup %1425 }
 0x2b2   :  { %1439 = vrcp.f32 %v1107_v19  ;;  %v1108_v21 = vadd.f32 1.0, %v1426_v20 }
 0x2b3   :  { %v1428_v22 = vpop.eup %1427 }
 0x2b4   :  { %1441 = vrcp.f32 %v1108_v21  ;;  %v1109_v23 = vadd.f32 1.0, %v1428_v22 }
 0x2b5   :  { %v1430_v25 = vpop.eup %1429 }
 0x2b6   :  { %v1432_v26 = vpop.eup %1431  ;;  %1443 = vrcp.f32 %v1109_v23 }
 0x2b7   :  { %v1434_v27 = vpop.eup %1433 }
 0x2b8   :  { %v1436_v28 = vpop.eup %1435  ;;  %v1110_v29 = vadd.f32 1.0, %v1434_v27 }
 0x2b9   :  { %v1438_v30 = vpop.eup %1437 }
 0x2ba   :  { %1445 = vrcp.f32 %v1110_v29 }
 0x2bc   :  { %v1440_v31 = vpop.eup %1439 }
 0x2be   :  { %v1442_v32 = vpop.eup %1441 }
 0x2c0   :  { %v1444_v33 = vpop.eup %1443 }
 0x2c4   :  { %v1446_v34 = vpop.eup %1445 }

</bundles_post_ra>
